<compile_context>
chip_gen: v6e
topology: v6e:2x2x1
jax: 0.10.0
libtpu: 0.0.40
codegen_flags: <defaults>
</compile_context>

<pallas_src>
import jax
import jax.numpy as jnp
from jax.experimental import pallas as pl
from jax.experimental.pallas import tpu as pltpu

_LANE = 128
_VMEM_BUDGET = 48 * 1024 * 1024  # fits v7x's 64 MiB physical VMEM with headroom


# ----------------------------- kernels -------------------------------------


def _head_dout1_kernel(x_ref, w1_ref, b1_ref, w2r_ref, b2_ref, o_ref):
    # fc1: [bm, D_in] @ [D_in, H] on the MXU, f32 accumulate.
    h = jnp.dot(x_ref[...], w1_ref[...], preferred_element_type=jnp.float32)
    h = jnp.maximum(h + b1_ref[...].astype(jnp.float32), 0.0)  # bias + ReLU (VPU)
    # fc2 with D_out == 1: per-row dot product as VPU mul + XLU lane reduce.
    # Avoids a second MXU push/pop whose result would be a single masked lane.
    out = jnp.sum(h * w2r_ref[...].astype(jnp.float32), axis=-1, keepdims=True)
    o_ref[...] = (out + b2_ref[0, 0].astype(jnp.float32)).astype(o_ref.dtype)


def _head_matmul_kernel(x_ref, w1_ref, b1_ref, w2_ref, b2_ref, o_ref):
    # General D_out path: two MXU matmuls, f32 accumulation.
    h = jnp.dot(x_ref[...], w1_ref[...], preferred_element_type=jnp.float32)
    h = jnp.maximum(h + b1_ref[...].astype(jnp.float32), 0.0)
    out = jnp.dot(h.astype(w2_ref.dtype), w2_ref[...],
                  preferred_element_type=jnp.float32)
    o_ref[...] = (out + b2_ref[...].astype(jnp.float32)).astype(o_ref.dtype)


# ----------------------------- wrapper helpers -------------------------------


def _sublane(dtype):
    return {4: 8, 2: 16, 1: 32}.get(jnp.dtype(dtype).itemsize, 8)


def _round_up(n, m):
    return ((n + m - 1) // m) * m


def _pad_rows(a, target_rows):
    pad = target_rows - a.shape[0]
    if pad == 0:
        return a
    return jnp.pad(a, ((0, pad), (0, 0)))


def _vmem_estimate(bm, d_in, h, d_out, itemsize):
    """Rough VMEM bytes for the gridded path (tile-padded to vreg granules)."""
    lp = lambda n: _round_up(n, _LANE)
    sp = lambda n: _round_up(n, 8)
    tiles = 2 * sp(bm) * (lp(d_in) + lp(d_out))          # double-buffered x / out
    resident = 2 * (sp(d_in) * lp(h) + 8 * lp(h)         # w1, b1
                    + sp(h) * lp(d_out) + 8 * lp(d_out))  # w2, b2
    return (tiles + resident) * itemsize


def _pick_bm(bm, d_in, h, d_out, itemsize, sub):
    """Shrink the batch tile until the VMEM estimate fits the budget."""
    bm = max(_round_up(bm, sub), sub)
    while bm > sub and _vmem_estimate(bm, d_in, h, d_out, itemsize) > _VMEM_BUDGET:
        bm = max(_round_up(bm // 2, sub), sub)
    return bm


# ----------------------------- wrapper --------------------------------------


def decision_head(x, w1, b1, w2, b2, *, bm=512):
    """Fused DecisionHead forward: relu(x @ w1 + b1) @ w2 + b2.

    x : [B, D_in]   (batch-major, features on lanes)
    w1: [D_in, H]   (pre-transposed vs. PyTorch fc1.weight)
    b1: [1, H]
    w2: [H, D_out]  (pre-transposed vs. PyTorch fc2.weight)
    b2: [1, D_out]
    """
    B, D_in = x.shape
    H, D_out = w2.shape
    assert w1.shape == (D_in, H), (w1.shape, (D_in, H))
    assert b1.shape == (1, H) and b2.shape == (1, D_out)

    sub = _sublane(x.dtype)
    itemsize = jnp.dtype(x.dtype).itemsize

    vmem = pl.BlockSpec(memory_space=pltpu.MemorySpace.VMEM)
    smem = pl.BlockSpec(memory_space=pltpu.MemorySpace.SMEM)
    small_params = pltpu.CompilerParams(vmem_limit_bytes=_VMEM_BUDGET)
    grid_params = pltpu.CompilerParams(
        dimension_semantics=("parallel",),
        vmem_limit_bytes=_VMEM_BUDGET)

    if D_out == 1:
        w2r = w2.T  # lane-major [1, H]; tiny per-call transpose (see TODO).
        bm_eff = _pick_bm(bm, D_in, H, 1, itemsize, sub)

        if B <= bm_eff:
            # Small batch: single invocation, no grid, no pipeline machinery,
            # no padding (whole-array VMEM refs accept arbitrary shapes).
            return pl.pallas_call(
                _head_dout1_kernel,
                out_shape=jax.ShapeDtypeStruct((B, 1), x.dtype),
                in_specs=[vmem, vmem, vmem, vmem, smem],
                out_specs=vmem,
                compiler_params=small_params,
            )(x, w1, b1, w2r, b2)

        # Large batch: 1-D "parallel" grid over bm_eff-row batch tiles (v7x's
        # second TensorCore takes half the rows; x / out are pipelined).
        # Weights/biases use constant index_maps so they stay VMEM-resident.
        B_p = _round_up(B, bm_eff)
        x_p = _pad_rows(x, B_p)  # zero rows are inert; sliced off below.
        out_p = pl.pallas_call(
            _head_dout1_kernel,
            out_shape=jax.ShapeDtypeStruct((B_p, 1), x.dtype),
            grid=(B_p // bm_eff,),
            in_specs=[
                pl.BlockSpec((bm_eff, D_in), lambda i: (i, 0)),
                pl.BlockSpec((D_in, H), lambda i: (0, 0)),
                pl.BlockSpec((1, H), lambda i: (0, 0)),
                pl.BlockSpec((1, H), lambda i: (0, 0)),
                smem,
            ],
            out_specs=pl.BlockSpec((bm_eff, 1), lambda i: (i, 0)),
            compiler_params=grid_params,
        )(x_p, w1, b1, w2r, b2)
        return out_p[:B, :]

    # ----- general D_out > 1 -----
    bm_eff = _pick_bm(bm, D_in, H, D_out, itemsize, sub)

    if B <= bm_eff:
        return pl.pallas_call(
            _head_matmul_kernel,
            out_shape=jax.ShapeDtypeStruct((B, D_out), x.dtype),
            in_specs=[vmem] * 5,
            out_specs=vmem,
            compiler_params=small_params,
        )(x, w1, b1, w2, b2)

    B_p = _round_up(B, bm_eff)
    x_p = _pad_rows(x, B_p)
    out_p = pl.pallas_call(
        _head_matmul_kernel,
        out_shape=jax.ShapeDtypeStruct((B_p, D_out), x.dtype),
        grid=(B_p // bm_eff,),
        in_specs=[
            pl.BlockSpec((bm_eff, D_in), lambda i: (i, 0)),
            pl.BlockSpec((D_in, H), lambda i: (0, 0)),
            pl.BlockSpec((1, H), lambda i: (0, 0)),
            pl.BlockSpec((H, D_out), lambda i: (0, 0)),
            pl.BlockSpec((1, D_out), lambda i: (0, 0)),
        ],
        out_specs=pl.BlockSpec((bm_eff, D_out), lambda i: (i, 0)),
        compiler_params=grid_params,
    )(x_p, w1, b1, w2, b2)
    return out_p[:B, :]


# ----------------------------- params / test --------------------------------


def init_params(key, input_dim, hidden_dim, output_dim=1, dtype=jnp.float32):
    """Deterministic init matching nn.Linear shapes (weights pre-transposed)."""
    k1, k2, k3, k4 = jax.random.split(key, 4)
    lim1 = 1.0 / (input_dim ** 0.5)
    lim2 = 1.0 / (hidden_dim ** 0.5)
    w1 = jax.random.uniform(k1, (input_dim, hidden_dim), dtype, -lim1, lim1)
    b1 = jax.random.uniform(k2, (1, hidden_dim), dtype, -lim1, lim1)
    w2 = jax.random.uniform(k3, (hidden_dim, output_dim), dtype, -lim2, lim2)
    b2 = jax.random.uniform(k4, (1, output_dim), dtype, -lim2, lim2)
    return w1, b1, w2, b2


def _ref(x, w1, b1, w2, b2):
    return jnp.maximum(x @ w1 + b1, 0.0) @ w2 + b2


if __name__ == "__main__":
    key = jax.random.PRNGKey(0)
    kx, kp, kx2, kp2 = jax.random.split(key, 4)

    batch = 8
    input_dim = 32
    hidden_dim = 32

    x = jax.random.normal(kx, (batch, input_dim), jnp.float32)
    w1, b1, w2, b2 = init_params(kp, input_dim, hidden_dim, 1)

    # --- small-batch, scalar-output path (no grid, VPU+XLU fc2, SMEM b2) ---
    out = jax.block_until_ready(decision_head(x, w1, b1, w2, b2))
    assert out.shape == (batch, 1), out.shape
    assert jnp.allclose(out, _ref(x, w1, b1, w2, b2), atol=1e-5, rtol=1e-5), \
        "small-batch mismatch"

    # --- batch-tiled ("parallel" grid) D_out==1 path, ragged batch ---
    big_batch = 300
    x_big = jax.random.normal(kx2, (big_batch, input_dim), jnp.float32)
    out_big = jax.block_until_ready(
        decision_head(x_big, w1, b1, w2, b2, bm=128))
    assert out_big.shape == (big_batch, 1), out_big.shape
    assert jnp.allclose(out_big, _ref(x_big, w1, b1, w2, b2),
                        atol=1e-4, rtol=1e-4), "tiled-batch mismatch"

    # --- general D_out > 1, small-batch (no grid) ---
    w1b, b1b, w2b, b2b = init_params(kp2, input_dim, hidden_dim, 4)
    out4 = jax.block_until_ready(decision_head(x, w1b, b1b, w2b, b2b))
    assert out4.shape == (batch, 4), out4.shape
    assert jnp.allclose(out4, _ref(x, w1b, b1b, w2b, b2b),
                        atol=1e-5, rtol=1e-5), "D_out>1 mismatch"

    # --- general D_out > 1, batch-tiled grid ---
    out4_big = jax.block_until_ready(
        decision_head(x_big, w1b, b1b, w2b, b2b, bm=128))
    assert out4_big.shape == (big_batch, 4), out4_big.shape
    assert jnp.allclose(out4_big, _ref(x_big, w1b, b1b, w2b, b2b),
                        atol=1e-4, rtol=1e-4), "D_out>1 tiled mismatch"

    print("KERNEL_OK")
</pallas_src>

<mosaic_0001>
module attributes {stable_mosaic.version = 11 : i64} {
  func.func @_head_dout1_kernel(%arg0: memref<8x32xf32, #tpu.memory_space<vmem>>, %arg1: memref<32x32xf32, #tpu.memory_space<vmem>>, %arg2: memref<1x32xf32, #tpu.memory_space<vmem>>, %arg3: memref<1x32xf32, #tpu.memory_space<vmem>>, %arg4: memref<1x1xf32, #tpu.memory_space<smem>>, %arg5: memref<8x1xf32, #tpu.memory_space<vmem>>) attributes {dimension_semantics = [], scalar_prefetch = 0 : i64, scratch_operands = 0 : i64, tpu.core_type = #tpu.core_type<tc>} {
    %c0 = arith.constant 0 : index
    %c0_0 = arith.constant 0 : index
    %0 = vector.load %arg0[%c0, %c0_0] : memref<8x32xf32, #tpu.memory_space<vmem>>, vector<8x32xf32>
    %c0_1 = arith.constant 0 : index
    %c0_2 = arith.constant 0 : index
    %1 = vector.load %arg1[%c0_1, %c0_2] : memref<32x32xf32, #tpu.memory_space<vmem>>, vector<32x32xf32>
    %cst = arith.constant dense<0.000000e+00> : vector<8x32xf32>
    %2 = tpu.matmul %0, %1, %cst {dimension_numbers = #tpu.dot_dimension_numbers<[1], [0], [0], [1], [0, 0, 1, 1], [], []>} : vector<8x32xf32>, vector<32x32xf32>, vector<8x32xf32> -> vector<8x32xf32>
    %c0_3 = arith.constant 0 : index
    %c0_4 = arith.constant 0 : index
    %3 = vector.load %arg2[%c0_3, %c0_4] : memref<1x32xf32, #tpu.memory_space<vmem>>, vector<1x32xf32>
    %4 = vector.broadcast %3 : vector<1x32xf32> to vector<8x32xf32>
    %5 = arith.addf %2, %4 : vector<8x32xf32>
    %cst_5 = arith.constant 0.000000e+00 : f32
    %6 = vector.broadcast %cst_5 : f32 to vector<8x32xf32>
    %7 = arith.maximumf %5, %6 : vector<8x32xf32>
    %c0_6 = arith.constant 0 : index
    %c0_7 = arith.constant 0 : index
    %8 = vector.load %arg3[%c0_6, %c0_7] : memref<1x32xf32, #tpu.memory_space<vmem>>, vector<1x32xf32>
    %9 = vector.broadcast %8 : vector<1x32xf32> to vector<8x32xf32>
    %10 = arith.mulf %7, %9 : vector<8x32xf32>
    %cst_8 = arith.constant dense<0.000000e+00> : vector<8xf32>
    %11 = vector.multi_reduction <add>, %10, %cst_8 [1] : vector<8x32xf32> to vector<8xf32>
    %12 = vector.shape_cast %11 : vector<8xf32> to vector<8x1xf32>
    %c0_9 = arith.constant 0 : index
    %c0_10 = arith.constant 0 : index
    %13 = memref.load %arg4[%c0_9, %c0_10] : memref<1x1xf32, #tpu.memory_space<smem>>
    %14 = vector.broadcast %13 : f32 to vector<8x1xf32>
    %15 = arith.addf %12, %14 : vector<8x1xf32>
    %c0_11 = arith.constant 0 : index
    %c0_12 = arith.constant 0 : index
    %16 = vector.load %arg5[%c0_11, %c0_12] : memref<8x1xf32, #tpu.memory_space<vmem>>, vector<8x1xf32>
    tpu.vector_store %arg5[%c0_11, %c0_12], %15 {strides = array<i32>} : memref<8x1xf32, #tpu.memory_space<vmem>>, vector<8x1xf32>,
    return
  }
}

</mosaic_0001>

<bundles_post_ra>
// kernel: tpu_custom_call.1
= control target key start
LH: loop header
LB: loop body
LE: loop exit
PB: predicated region body
PF: predicated region fallthrough
CT: control target
= control target key end

     0   :  { %11 = vsyncpa [#allocation4], 0  ;;  %s279_s0 = inlined_call_operand.hbm [shape: f32[8,32], index: 0, kind: input, shape index: {}]   ;;  %s280_s1 = inlined_call_operand.hbm [shape: f32[32,32], index: 1, kind: input, shape index: {}]   ;;  %s281_s2 = inlined_call_operand.vmem [shape: f32[1,32], index: 2, kind: input, shape index: {}]   ;;  %s282_s3 = inlined_call_operand.vmem [shape: f32[1,32], index: 3, kind: input, shape index: {}]   ;;  %s283_s4 = inlined_call_operand.<no memory space> [shape: f32[1,1], index: 4, kind: input, shape index: {}]   ;;  %s284_s5 = inlined_call_operand.vmem [shape: f32[8,1], index: 5, kind: output, shape index: {}]  }
   0x1   :  { %12 = vsyncpa [#allocation6], 0  ;;  %s225_s18 = smov [#allocation3]   ;;  %s226_s20 = smov [#allocation5]  }
   0x2   :  { %s19_s19 = sshll.u32 %s225_s18, 4  ;;  %s28_s21 = sshll.u32 %s226_s20, 4  ;;  %s20_s19 = int_to_ptr.vmem [resolvable:$true] %s19_s19  ;;  %s29_s21 = int_to_ptr.vmem [resolvable:$true] %s28_s21 }
   0x3   :  { %s189_s22 = scalar_lea.vmem %s20_s19, 128  ;;  %p194_p1 = scmp.lt.s32.totalorder %s20_s19, %s20_s19 }
   0x4   :  { %p190_p0 = scmp.ne.s32.totalorder %s20_s19, %s189_s22  ;;  %p195_p2 = scmp.lt.s32.totalorder %s189_s22, %s189_s22 }
   0x6   :  { %p196_p3 = por %p195_p2, %p194_p1 }
   0x8   :  { %p197_p4 = pnand %p196_p3, %p190_p0 }
   0xa   :  { %200 = shalt.err (!%p197_p4)
}
   0xb   :  { %22 = dma.hbm_to_vmem [thread:$0]  %s279_s0, 128, %s20_s19, [#allocation4]  }
   0xc   :  { %s209_s25 = scalar_lea.vmem %s29_s21, 512  ;;  %p214_p6 = scmp.lt.s32.totalorder %s29_s21, %s29_s21 }
   0xd   :  { %p210_p5 = scmp.ne.s32.totalorder %s29_s21, %s209_s25  ;;  %p215_p7 = scmp.lt.s32.totalorder %s209_s25, %s209_s25 }
   0xf   :  { %p216_p8 = por %p215_p7, %p214_p6 }
  0x11   :  { %p217_p9 = pnand %p216_p8, %p210_p5 }
  0x13   :  { %220 = shalt.err (!%p217_p9)
}
  0x14   :  { %s227_s26 = smov 128   ;;  %s228_s27 = smov 8  }
  0x15   :  { %34 = dma.hbm_to_vmem [thread:$0]  %s280_s1, 512, %s29_s21, [#allocation6], %s227_s26, %s227_s26, %s228_s27  }
  0x16   :  { %221 = dma.done.wait [#allocation4], 128  }
  0x17   :  { %222 = vsyncadd [#allocation4], 4294967168 }
  0x18   :  { %223 = dma.done.wait [#allocation6], 512  }
  0x19   :  { %224 = vsyncadd [#allocation6], 4294966784  ;;  %v229_v0 = vmov 0.0   ;;  %vm230_vm0 = vmmov 0   ;;  %v51_v1 = vld [vmem:[#allocation5 + $0x18] sm:$0xff]  ;;  %v50_v2 = vld [vmem:[#allocation5 + $0x10] sm:$0xff]  ;;  %v146_v14 = vstv %s283_s4 }
  0x1a   :  { %164 = vmatprep.subr.mxu0 %v229_v0  ;;  %172 = vmatprep.mubr.msk.f32.mxu0 %vm230_vm0, %v229_v0  ;;  %v49_v3 = vld [vmem:[#allocation5 + $0x8] sm:$0xff]  ;;  %v48_v4 = vld [vmem:[#allocation5] sm:$0xff]  ;;  %v47_v5 = vld [vmem:[#allocation3] sm:$0xff]  ;;  %vm59_vm1 = vcmask 261120   ;;  %vm148_vm2 = vcmask 7168  }
  0x1b   :  { %165 = vmatpush3.msra.mxu0 %v51_v1  ;;  %v156_v6 = vld [vmem:[%s281_s2] ss:$0 sm:$0xff] }
  0x1c   :  { %166 = vmatprep.subr.mxu0 %v229_v0  ;;  %v158_v10 = vld [vmem:[%s282_s3] ss:$0 sm:$0xff] }
  0x1d   :  { %167 = vmatpush3.msra.mxu0 %v50_v2 }
  0x1e   :  { %168 = vmatprep.subr.mxu0 %v229_v0 }
  0x1f   :  { %169 = vmatpush3.msra.mxu0 %v49_v3 }
  0x20   :  { %170 = vmatprep.subr.mxu0 %v229_v0 }
  0x21   :  { %171 = vmatpush3.msra.mxu0 %v48_v4 }
  0x22   :  { %173 = vmatmul.mubr.msk.f32.vlgmr.msra.gmra.mxu0 %vm59_vm1, %v47_v5 }
  0xe2   :  { %v129_v7 = vpop.f32.mrf.mxu0 }
  0xe3   :  { %v130_v8 = vadd.f32 %v156_v6, %v129_v7 }
  0xe4   :  { %v174_v9 = vpop.f32.mrf.mxu0 }
  0xe5   :  { %v133_v11 = vmax.f32 %v130_v8, 0.0 }
  0xe7   :  { %v141_v12 = vmul.f32 %v158_v10, %v133_v11 }
  0xe9   :  { %v142_v13 = vsel %vm59_vm1, %v141_v12, 0.0 }
  0xea   :  { %143 = vadd.xlane.f32.xlu0 %v142_v13 }
 0x173   :  { %v144_v15 = vpop.xlane.xlu0 %143 }
 0x174   :  { %v147_v16 = vadd.f32 %v146_v14, %v144_v15 }
 0x176   :  { %149 = vst.msk [vmem:[%s284_s5] sm:$0xff] %vm148_vm2, %v147_v16 }
 0x177   :  { %154 = vsyncpa [#allocation4], 1 }
 0x178   :  { %155 = vsyncpa [#allocation6], 1 }

</bundles_post_ra>
